<compile_context>
chip_gen: v7x
topology: tpu7x:2x2x1
jax: 0.10.0
libtpu: 0.0.40
codegen_flags: <defaults>
</compile_context>

<pallas_src>
import functools

import jax
import jax.numpy as jnp
from jax.experimental import pallas as pl
from jax.experimental.pallas import tpu as pltpu


def _gem_kernel(p_ref, x_ref, o_ref, *, eps, inv_hw, static_int_p):
    # p_ref: (1,) scalar exponent in SMEM
    # x_ref: (TILE_M, HW) tile in VMEM (native dtype)
    # o_ref: (TILE_M, 1) pooled output tile in VMEM
    x = x_ref[...].astype(jnp.float32)
    xc = jnp.maximum(x, eps)  # clamp(min=eps); eps > 0 keeps log well-defined

    if static_int_p is not None:
        # Trace-time integer p: integer power stays on the VPU, no per-element
        # transcendentals (EUP would be the binding unit on v7x otherwise).
        p = jnp.float32(static_int_p)
        xp = xc
        for _ in range(static_int_p - 1):
            xp = xp * xc
    else:
        # Learned / runtime p: x**p == exp(p * log(x)) since x >= eps > 0.
        p = p_ref[0]
        xp = jnp.exp(p * jnp.log(xc))

    # Full-spatial average pool: lane-axis sum * compile-time constant 1/HW.
    mean = jnp.sum(xp, axis=-1, keepdims=True) * inv_hw

    # .pow(1/p) epilogue on a (TILE_M, 1) column — negligible cost.
    inv_p = 1.0 / p
    out = jnp.exp(jnp.log(mean) * inv_p)
    o_ref[...] = out.astype(o_ref.dtype)


def _pick_tile_m(m, hw, itemsize):
    """Largest row tile (multiple of 8) that keeps each double-buffered input
    buffer around ~6 MiB, comfortably inside the smallest per-TC VMEM (v7x)."""
    target_bytes = 6 * 1024 * 1024            # per input buffer (x2 double-buffer)
    t = (target_bytes // max(1, hw * itemsize)) // 8 * 8
    t = max(8, t)
    m_ceil8 = ((m + 7) // 8) * 8               # never bigger than needed
    return min(t, m_ceil8)


def gem_pallas(x, p, eps=1e-6):
    """GeM pooling. x: (N, C, H, W) -> (N, C, 1, 1)."""
    N, C, H, W = x.shape
    M = N * C
    HW = H * W
    x2 = x.reshape(M, HW)                      # free metadata reshape (contiguous NCHW)

    # Optional trace-time specialization when p is a static Python int.
    static_int_p = None
    if isinstance(p, (int, float)) and float(p).is_integer() and 1 <= int(p) <= 8:
        static_int_p = int(p)

    tile_m = _pick_tile_m(M, HW, x2.dtype.itemsize)
    grid = (pl.cdiv(M, tile_m),)               # ragged last block handled by Pallas

    p_arr = jnp.asarray(p, jnp.float32).reshape(1)

    out = pl.pallas_call(
        functools.partial(
            _gem_kernel, eps=float(eps), inv_hw=1.0 / HW, static_int_p=static_int_p
        ),
        out_shape=jax.ShapeDtypeStruct((M, 1), x.dtype),
        grid=grid,
        in_specs=[
            pl.BlockSpec(memory_space=pltpu.MemorySpace.SMEM),      # p (scalar)
            pl.BlockSpec((tile_m, HW), lambda i: (i, 0)),           # x row tile
        ],
        out_specs=pl.BlockSpec((tile_m, 1), lambda i: (i, 0)),
        compiler_params=pltpu.CompilerParams(
            dimension_semantics=("parallel",),   # shard row tiles across TCs (v7x)
            vmem_limit_bytes=48 << 20,           # ~12 MiB buffers + headroom, < 64 MiB
        ),
    )(p_arr, x2)

    return out.reshape(N, C, 1, 1)


def gem_reference(x, p, eps=1e-6):
    """Pure-JAX reference matching the PyTorch semantics."""
    xc = jnp.maximum(x.astype(jnp.float32), eps)
    xp = xc ** jnp.asarray(p, jnp.float32)
    mean = jnp.mean(xp, axis=(-2, -1), keepdims=True)
    return (mean ** (1.0 / jnp.asarray(p, jnp.float32))).astype(x.dtype)


if __name__ == "__main__":
    key = jax.random.PRNGKey(0)

    # Deterministic parameter init, matching GeM.__init__: p = ones(1) * 3
    p_param = jnp.ones((1,), jnp.float32) * 3.0
    eps = 1e-6

    # Small input consistent with the forward: NCHW
    N, C, H, W = 2, 4, 16, 16
    x = jax.random.normal(key, (N, C, H, W), dtype=jnp.float32)

    # Runtime (learned-parameter) path, as in the PyTorch module.
    out = gem_pallas(x, p_param[0], eps=eps)
    out = jax.block_until_ready(out)

    ref = gem_reference(x, p_param[0], eps=eps)
    assert out.shape == (N, C, 1, 1), out.shape
    assert jnp.allclose(out, ref, rtol=1e-4, atol=1e-5), (
        float(jnp.max(jnp.abs(out - ref)))
    )

    # Static integer-p fast path (no per-element transcendentals).
    out_static = jax.block_until_ready(gem_pallas(x, 3, eps=eps))
    assert jnp.allclose(out_static, ref, rtol=1e-4, atol=1e-5), (
        float(jnp.max(jnp.abs(out_static - ref)))
    )

    print("KERNEL_OK")
</pallas_src>

<mosaic_0001>
module attributes {stable_mosaic.version = 11 : i64} {
  func.func @_gem_kernel(%arg0: i32, %arg1: memref<1xf32, #tpu.memory_space<smem>>, %arg2: memref<8x256xf32, #tpu.memory_space<vmem>>, %arg3: memref<8x1xf32, #tpu.memory_space<vmem>>) attributes {dimension_semantics = [#tpu.dimension_semantics<parallel>], iteration_bounds = array<i64: 1>, scalar_prefetch = 0 : i64, scratch_operands = 0 : i64, tpu.core_type = #tpu.core_type<tc>, window_params = [{transform_indices = @transform_0, window_bounds = array<i64: 1>}, {transform_indices = @transform_1, window_bounds = array<i64: 8, 256>}, {transform_indices = @transform_2, window_bounds = array<i64: 8, 1>}]} {
    %c0 = arith.constant 0 : index
    %c0_0 = arith.constant 0 : index
    %0 = vector.load %arg2[%c0, %c0_0] : memref<8x256xf32, #tpu.memory_space<vmem>>, vector<8x256xf32>
    %cst = arith.constant 9.99999997E-7 : f32
    %1 = vector.broadcast %cst : f32 to vector<8x256xf32>
    %2 = arith.maximumf %0, %1 : vector<8x256xf32>
    %c0_1 = arith.constant 0 : index
    %3 = memref.load %arg1[%c0_1] : memref<1xf32, #tpu.memory_space<smem>>
    %4 = math.log %2 : vector<8x256xf32>
    %5 = vector.broadcast %3 : f32 to vector<8x256xf32>
    %6 = arith.mulf %5, %4 : vector<8x256xf32>
    %7 = math.exp %6 : vector<8x256xf32>
    %cst_2 = arith.constant dense<0.000000e+00> : vector<8xf32>
    %8 = vector.multi_reduction <add>, %7, %cst_2 [1] : vector<8x256xf32> to vector<8xf32>
    %9 = vector.shape_cast %8 : vector<8xf32> to vector<8x1xf32>
    %cst_3 = arith.constant 3.906250e-03 : f32
    %10 = vector.broadcast %cst_3 : f32 to vector<8x1xf32>
    %11 = arith.mulf %9, %10 : vector<8x1xf32>
    %cst_4 = arith.constant 1.000000e+00 : f32
    %12 = arith.divf %cst_4, %3 : f32
    %13 = math.log %11 : vector<8x1xf32>
    %14 = vector.broadcast %12 : f32 to vector<8x1xf32>
    %15 = arith.mulf %13, %14 : vector<8x1xf32>
    %16 = math.exp %15 : vector<8x1xf32>
    %c0_5 = arith.constant 0 : index
    %c0_6 = arith.constant 0 : index
    %17 = vector.load %arg3[%c0_5, %c0_6] : memref<8x1xf32, #tpu.memory_space<vmem>>, vector<8x1xf32>
    tpu.vector_store %arg3[%c0_5, %c0_6], %16 {strides = array<i32>} : memref<8x1xf32, #tpu.memory_space<vmem>>, vector<8x1xf32>,
    return
  }
  func.func @transform_0(%arg0: i32) -> i32 {
    %c0_i32 = arith.constant 0 : i32
    %c0_i32_0 = arith.constant 0 : i32
    return %c0_i32 : i32
  }
  func.func @transform_1(%arg0: i32) -> (i32, i32) {
    %c0_i32 = arith.constant 0 : i32
    %c0_i32_0 = arith.constant 0 : i32
    return %arg0, %c0_i32 : i32, i32
  }
  func.func @transform_2(%arg0: i32) -> (i32, i32) {
    %c0_i32 = arith.constant 0 : i32
    %c0_i32_0 = arith.constant 0 : i32
    return %arg0, %c0_i32 : i32, i32
  }
}

</mosaic_0001>

<bundles_post_ra>
// kernel: tpu_custom_call.1
= control target key start
LH: loop header
LB: loop body
LE: loop exit
PB: predicated region body
PF: predicated region fallthrough
CT: control target
= control target key end

     0   :  { %8 = vsyncpa [#allocation4], 0  ;;  %s101_s9 = smov [#allocation3]   ;;  %s135_s0 = inlined_call_operand.<no memory space> [shape: f32[1], index: 0, kind: input, shape index: {}]   ;;  %s136_s1 = inlined_call_operand.hbm [shape: f32[8,256], index: 1, kind: input, shape index: {}]   ;;  %s137_s2 = inlined_call_operand.vmem [shape: f32[8,1], index: 2, kind: output, shape index: {}]  }
   0x1   :  { %s17_s10 = sshll.u32 %s101_s9, 4  ;;  %s77_s13 = scalar_lea.hbm %s136_s1, 256  ;;  %s18_s10 = int_to_ptr.vmem [resolvable:$true] %s17_s10 }
   0x2   :  { %p78_p0 = scmp.ne.s32.totalorder %s136_s1, %s77_s13  ;;  %p81_p1 = scmp.lt.u32.totalorder %s77_s13, %s136_s1 }
   0x4   :  { %p83_p2 = pnand %p81_p1, %p78_p0 }
   0x6   :  { %86 = shalt.err (!%p83_p2)
}
   0x7   :  { %s87_s18 = scalar_lea.vmem %s18_s10, 256  ;;  %p92_p4 = scmp.lt.s32.totalorder %s18_s10, %s18_s10 }
   0x8   :  { %p88_p3 = scmp.ne.s32.totalorder %s18_s10, %s87_s18  ;;  %p93_p5 = scmp.lt.s32.totalorder %s87_s18, %s87_s18 }
   0xa   :  { %p94_p6 = por %p93_p5, %p92_p4 }
   0xc   :  { %p95_p7 = pnand %p94_p6, %p88_p3 }
   0xe   :  { %98 = shalt.err (!%p95_p7)
}
   0xf   :  { %20 = dma.hbm_to_vmem [thread:$0]  %s136_s1, 256, %s18_s10, [#allocation4]  }
  0x10   :  { %99 = dma.done.wait [#allocation4], 256  }
  0x11   :  { %100 = vsyncadd [#allocation4], 4294967040  ;;  %v33_v0 = vstv %s135_s0  ;;  %v24_v1 = vld [vmem:[#allocation3] sm:$0xff]  ;;  %v25_v2 = vld [vmem:[#allocation3 + $0x8] sm:$0xff]  ;;  %vm53_vm0 = vcmask 7168  }
  0x12   :  { %63 = vrcp.f32 %v33_v0  ;;  %v26_v3 = vmax.f32 %v24_v1, 1e-06  ;;  %v27_v4 = vmax.f32 %v25_v2, 1e-06 }
  0x14   :  { %65 = vlog2.f32 %v26_v3 }
  0x15   :  { %67 = vlog2.f32 %v27_v4 }
  0x1c   :  { %v64_v5 = vpop.eup %63 }
  0x1d   :  { %60 = vpush %v64_v5 }
  0x1e   :  { %v66_v6 = vpop.eup %65 }
  0x1f   :  { %v68_v7 = vpop.eup %67  ;;  %v30_v8 = vmul.f32 0.6931472, %v66_v6 }
  0x20   :  { %v32_v9 = vmul.f32 0.6931472, %v68_v7 }
  0x21   :  { %v34_v10 = vmul.f32 %v33_v0, %v30_v8 }
  0x22   :  { %v35_v11 = vmul.f32 %v33_v0, %v32_v9 }
  0x23   :  { %v36_v12 = vmul.f32 1.442695, %v34_v10 }
  0x24   :  { %v38_v13 = vmul.f32 1.442695, %v35_v11 }
  0x25   :  { %69 = vpow2.f32 %v36_v12 }
  0x26   :  { %71 = vpow2.f32 %v38_v13 }
  0x2f   :  { %v70_v14 = vpop.eup %69 }
  0x30   :  { %v72_v15 = vpop.eup %71 }
  0x31   :  { %v40_v16 = vadd.f32 %v72_v15, %v70_v14 }
  0x33   :  { %41 = vadd.xlane.f32.xlu0 %v40_v16 }
  0x4e   :  { %s61_s0 = spop %60 }
  0x4f   :  { %v49_v20 = vstv %s61_s0 }
  0xc0   :  { %v42_v17 = vpop.xlane.xlu0 %41 }
  0xc1   :  { %v43_v18 = vmul.f32 0.00390625, %v42_v17 }
  0xc3   :  { %73 = vlog2.f32 %v43_v18 }
  0xcd   :  { %v74_v19 = vpop.eup %73 }
  0xce   :  { %v48_v21 = vmul.f32 0.6931472, %v74_v19 }
  0xd0   :  { %v50_v22 = vmul.f32 %v49_v20, %v48_v21 }
  0xd2   :  { %v51_v23 = vmul.f32 1.442695, %v50_v22 }
  0xd4   :  { %75 = vpow2.f32 %v51_v23 }
  0xde   :  { %v76_v24 = vpop.eup %75 }
  0xdf   :  { %54 = vst.msk [vmem:[%s137_s2] sm:$0xff] %vm53_vm0, %v76_v24 }
  0xe0   :  { %59 = vsyncpa [#allocation4], 1 }

</bundles_post_ra>
